<compile_context>
chip_gen: v5e
topology: v5e:2x2
jax: 0.10.0
libtpu: 0.0.40
codegen_flags: <defaults>
</compile_context>

<pallas_src>
import functools

import jax
import jax.numpy as jnp
from jax.experimental import pallas as pl
from jax.experimental.pallas import tpu as pltpu


def _round_up(v, m):
    return ((v + m - 1) // m) * m


def _pick_tile_m(m):
    """M-tile: multiple of 16 (bf16 sublane packing), aiming for >= ~8 grid
    steps, capped at 1024, preferring an exact divisor of M (no M padding and
    no trailing output-slice copy)."""
    target = max(16, min(1024, _round_up(-(-m // 8), 16)))
    for cand in range(target, 15, -16):
        if m % cand == 0:
            return cand
    return target


def _patch_embed_kernel(x_ref, w_ref, b_ref, o_ref):
    # x_ref: (TM, K) patch rows, w_ref: (K, Ep), b_ref: (1, Ep) f32,
    # o_ref: (TM, Ep).  Full-K contraction on the MXU with f32 accumulation;
    # bias added in f32; single cast on the lane-dense store.
    acc = jnp.dot(x_ref[...], w_ref[...], preferred_element_type=jnp.float32)
    o_ref[...] = (acc + b_ref[...]).astype(o_ref.dtype)


def patch_embedding(x, weight, bias, patch_dim, *,
                    compute_dtype=jnp.bfloat16, out_dtype=jnp.bfloat16):
    """x: (B, C, H, W); weight: (E, C, p, p); bias: (E,) -> (B, num_patches, E)."""
    B, C, H, W = x.shape
    E = weight.shape[0]
    p = patch_dim
    hp, wp = H // p, W // p
    num_patches = hp * wp

    # Patch unfold (Conv2d with stride=p == unfold + matmul).  Kept in the
    # wrapper; allow_input_fusion below lets XLA fold this relayout / cast into
    # the pallas_call operand rather than a separate HBM round trip.
    # TODO(synk): move the unfold fully into the kernel (grid over
    # (batch, patch-row), in-VMEM (C,p,wp,p)->(wp, C*p*p) rearrange) once that
    # relayout lowers reliably in Mosaic.
    x = x[:, :, :hp * p, :wp * p]
    patches = x.reshape(B, C, hp, p, wp, p)
    patches = jnp.transpose(patches, (0, 2, 4, 1, 3, 5))
    patches = patches.reshape(B * num_patches, C * p * p).astype(compute_dtype)

    # Conv weight as projection matrix: (E, C*p*p) -> (C*p*p, E).
    w_mat = weight.reshape(E, C * p * p).T.astype(compute_dtype)
    M, K = patches.shape

    # Pad only the embedding dim (lane-dense output); K stays unpadded
    # (full-dim block, Mosaic pads contraction lanes internally for free).
    Ep = _round_up(E, 128)
    TM = _pick_tile_m(M)
    Mp = _round_up(M, TM)

    if Mp != M:
        patches = jnp.pad(patches, ((0, Mp - M), (0, 0)))
    if Ep != E:
        w_mat = jnp.pad(w_mat, ((0, 0), (0, Ep - E)))
    b_row = jnp.pad(bias.astype(jnp.float32), (0, Ep - E)).reshape(1, Ep)

    # VMEM budget from the actual tile sizes (pipeline double-buffers each
    # operand), with ample headroom but far below v7x's 64 MiB physical VMEM.
    # Note: weight/bias are grid-invariant (never re-fetched); pl.Buffered(1)
    # on their specs would shave their second buffer but is skipped here for
    # compile-safety across Pallas versions.
    bytes_per_step = (
        TM * K * jnp.dtype(compute_dtype).itemsize        # streamed activation
        + TM * Ep * jnp.dtype(out_dtype).itemsize         # output tile
        + K * Ep * jnp.dtype(compute_dtype).itemsize      # resident weight
        + Ep * 4)                                         # resident bias
    vmem_limit = int(min(max(4 * bytes_per_step, 8 * 2**20), 56 * 2**20))

    out = pl.pallas_call(
        _patch_embed_kernel,
        out_shape=jax.ShapeDtypeStruct((Mp, Ep), out_dtype),
        grid=(Mp // TM,),
        in_specs=[
            # Streaming M tiles (double-buffered by the pipeline).
            pl.BlockSpec((TM, K), lambda i: (i, 0)),
            # Grid-invariant weight / bias: same block every step -> no re-DMA.
            pl.BlockSpec((K, Ep), lambda i: (0, 0)),
            pl.BlockSpec((1, Ep), lambda i: (0, 0)),
        ],
        out_specs=pl.BlockSpec((TM, Ep), lambda i: (i, 0)),
        compiler_params=pltpu.CompilerParams(
            dimension_semantics=("parallel",),
            allow_input_fusion=[True, True, True],
            vmem_limit_bytes=vmem_limit,
        ),
    )(patches, w_mat, b_row)

    # When TM | M and 128 | E these slices / reshape are metadata no-ops.
    return out[:M, :E].reshape(B, num_patches, E)


if __name__ == "__main__":
    # Small shapes consistent with the module:
    # image_dim=16, patch_dim=4, channels=3, embed_size=32, batch=2
    B, C, H, W = 2, 3, 16, 16
    patch_dim = 4
    embed_size = 32

    key = jax.random.PRNGKey(0)
    kx, kw, kb = jax.random.split(key, 3)

    x = jax.random.normal(kx, (B, C, H, W), dtype=jnp.float32)
    weight = jax.random.normal(
        kw, (embed_size, C, patch_dim, patch_dim), dtype=jnp.float32) * 0.02
    bias = jax.random.normal(kb, (embed_size,), dtype=jnp.float32) * 0.02

    fn = jax.jit(functools.partial(patch_embedding, patch_dim=patch_dim))
    out = jax.block_until_ready(fn(x, weight, bias))

    num_patches = (H // patch_dim) ** 2
    assert out.shape == (B, num_patches, embed_size), out.shape
    assert out.dtype == jnp.bfloat16, out.dtype

    # Reference: strided conv (the PyTorch module's forward), f32.
    ref = jax.lax.conv_general_dilated(
        x, weight,
        window_strides=(patch_dim, patch_dim),
        padding="VALID",
        dimension_numbers=("NCHW", "OIHW", "NCHW"),
    ) + bias.reshape(1, embed_size, 1, 1)
    ref = ref.reshape(B, embed_size, num_patches).transpose(0, 2, 1)

    # bf16 MXU operands / bf16 output with f32 accumulation -> loosened tol.
    out_f32 = out.astype(jnp.float32)
    max_err = float(jnp.max(jnp.abs(out_f32 - ref)))
    assert jnp.allclose(out_f32, ref, atol=2e-2, rtol=2e-2), max_err

    print("KERNEL_OK")
</pallas_src>

<mosaic_0001>
module attributes {stable_mosaic.version = 11 : i64} {
  func.func @_patch_embed_kernel(%arg0: i32, %arg1: memref<16x48xbf16, #tpu.memory_space<vmem>>, %arg2: memref<48x128xbf16, #tpu.memory_space<vmem>>, %arg3: memref<1x128xf32, #tpu.memory_space<vmem>>, %arg4: memref<16x128xbf16, #tpu.memory_space<vmem>>) attributes {dimension_semantics = [#tpu.dimension_semantics<parallel>], iteration_bounds = array<i64: 2>, scalar_prefetch = 0 : i64, scratch_operands = 0 : i64, tpu.core_type = #tpu.core_type<tc>, window_params = [{transform_indices = @transform_0, window_bounds = array<i64: 16, 48>}, {pipeline_mode = #tpu.pipeline_mode<synchronous>, transform_indices = @transform_1, window_bounds = array<i64: 48, 128>}, {pipeline_mode = #tpu.pipeline_mode<synchronous>, transform_indices = @transform_2, window_bounds = array<i64: 1, 128>}, {transform_indices = @transform_3, window_bounds = array<i64: 16, 128>}]} {
    %c0 = arith.constant 0 : index
    %c0_0 = arith.constant 0 : index
    %0 = vector.load %arg1[%c0, %c0_0] : memref<16x48xbf16, #tpu.memory_space<vmem>>, vector<16x48xbf16>
    %c0_1 = arith.constant 0 : index
    %c0_2 = arith.constant 0 : index
    %1 = vector.load %arg2[%c0_1, %c0_2] : memref<48x128xbf16, #tpu.memory_space<vmem>>, vector<48x128xbf16>
    %cst = arith.constant dense<0.000000e+00> : vector<16x128xf32>
    %2 = tpu.matmul %0, %1, %cst {dimension_numbers = #tpu.dot_dimension_numbers<[1], [0], [0], [1], [0, 0, 1, 1], [], []>} : vector<16x48xbf16>, vector<48x128xbf16>, vector<16x128xf32> -> vector<16x128xf32>
    %c0_3 = arith.constant 0 : index
    %c0_4 = arith.constant 0 : index
    %3 = vector.load %arg3[%c0_3, %c0_4] : memref<1x128xf32, #tpu.memory_space<vmem>>, vector<1x128xf32>
    %4 = vector.broadcast %3 : vector<1x128xf32> to vector<16x128xf32>
    %5 = arith.addf %2, %4 : vector<16x128xf32>
    %6 = arith.truncf %5 : vector<16x128xf32> to vector<16x128xbf16>
    %c0_5 = arith.constant 0 : index
    %c0_6 = arith.constant 0 : index
    %7 = vector.load %arg4[%c0_5, %c0_6] : memref<16x128xbf16, #tpu.memory_space<vmem>>, vector<16x128xbf16>
    tpu.vector_store %arg4[%c0_5, %c0_6], %6 {strides = array<i32>} : memref<16x128xbf16, #tpu.memory_space<vmem>>, vector<16x128xbf16>,
    return
  }
  func.func @transform_0(%arg0: i32) -> (i32, i32) {
    %c0_i32 = arith.constant 0 : i32
    %c0_i32_0 = arith.constant 0 : i32
    return %arg0, %c0_i32 : i32, i32
  }
  func.func @transform_1(%arg0: i32) -> (i32, i32) {
    %c0_i32 = arith.constant 0 : i32
    %c0_i32_0 = arith.constant 0 : i32
    %c0_i32_1 = arith.constant 0 : i32
    return %c0_i32, %c0_i32_0 : i32, i32
  }
  func.func @transform_2(%arg0: i32) -> (i32, i32) {
    %c0_i32 = arith.constant 0 : i32
    %c0_i32_0 = arith.constant 0 : i32
    %c0_i32_1 = arith.constant 0 : i32
    return %c0_i32, %c0_i32_0 : i32, i32
  }
  func.func @transform_3(%arg0: i32) -> (i32, i32) {
    %c0_i32 = arith.constant 0 : i32
    %c0_i32_0 = arith.constant 0 : i32
    return %arg0, %c0_i32 : i32, i32
  }
}

</mosaic_0001>

<bundles_post_ra>
// kernel: patch_embedding.2
= control target key start
LH: loop header
LB: loop body
LE: loop exit
PB: predicated region body
PF: predicated region fallthrough
CT: control target
= control target key end

     0   :  { %s759_s0 = inlined_call_operand.vmem [shape: bf16[32,48], index: 0, kind: input, shape index: {}]   ;;  %s760_s1 = inlined_call_operand.vmem [shape: bf16[48,32], index: 1, kind: input, shape index: {}]   ;;  %s761_s2 = inlined_call_operand.<no memory space> [shape: bf16[], index: 2, kind: input, shape index: {}]   ;;  %s762_s3 = inlined_call_operand.vmem [shape: f32[32], index: 3, kind: input, shape index: {}]   ;;  %s763_s4 = inlined_call_operand.<no memory space> [shape: f32[], index: 4, kind: input, shape index: {}]   ;;  %s764_s5 = inlined_call_operand.hbm [shape: bf16[32,128], index: 5, kind: output, shape index: {}]  }
   0x1   :  { %v10_v0 = vstv %s761_s2  ;;  %v15_v1 = vstv %s763_s4 }
   0x2   :  { %v648_v2 = vunpack.i.l.bf16 %v10_v0 }
   0x3   :  { %16 = vsyncpa [#allocation13], 0 }
   0x4   :  { %18 = vsyncpa [#allocation13 + $0x1], 0  ;;  %s650_s22 = smov 0   ;;  %s652_s23 = smov 0  }
   0x5   :  { %s654_s24 = smov 0   ;;  %s656_s25 = smov 0  }
   0x6 LB: > { %s671_s2 = sadd.s32 4294967295, %s608_s25   ;;  %s460_s26 = sadd.s32 4294967294, %s608_s25   ;;  %s608_s25 = sphi %s656_s25, %s770_s25   ;;  %s604_s24 = sphi %s654_s24, %s769_s24   ;;  %s600_s23 = sphi %s652_s23, %s768_s23   ;;  %s596_s22 = sphi %s650_s22, %s767_s22  }
   0x7   : > { %s675_s27 = sadd.s32 1, %s608_s25   ;;  %s99_s28 = sadd.s32 1, %s604_s24 }
   0x8   : > { %s96_s29 = ssub.s32 %s608_s25, %s675_s27  ;;  %p109_p0 = scmp.ne.s32.totalorder %s604_s24, %s600_s23 }
   0x9   : > { %p97_p1 = scmp.eq.s32.totalorder %s96_s29, 0  ;;  %p110_p2 = scmp.eq.s32.totalorder %s671_s2, 1 }
   0xa   : > { %p115_p3 = scmp.ne.s32.totalorder %s600_s23, %s596_s22  ;;  %p116_p4 = scmp.eq.s32.totalorder %s460_s26, 1 }
   0xb   : > { %s686_s30 = scalar_select %p97_p1, %s604_s24, %s99_s28  }
   0xc   : > { %p688_p5 = por %p110_p2, %p109_p0  ;;  %p692_p6 = por %p116_p4, %p115_p3 }
   0xd   : > { %p463_p7 = scmp.ge.s32.totalorder %s608_s25, 1  ;;  %p149_p8 = scmp.lt.s32.totalorder %s608_s25, 3 }
   0xf   : > { %p150_p9 = pnand %p463_p7, %p149_p8 }
  0x11   : > { %153 = sbr.rel (%p150_p9) target bundleno = 192 (0xc0), region = 32 }
  0x16   : > { %v192_v3 = vlaneseq  ;;  %v470_v4 = vld [vmem:[%s760_s1 + $0x10] sm:$0xff]   ;;  %v468_v5 = vld [vmem:[%s760_s1 + $0x8] sm:$0xff]   ;;  %v189_v6 = vld [vmem:[%s760_s1] sm:$0xff]   ;;  %s465_s18 = sshll.u32 %s671_s2, 1  ;;  %vm360_vm2 = vcmask 392192   ;;  %s170_s28 = sand.u32 1, %s600_s23  }
  0x17   : > { %v281_v7 = vunpack.c.l.bf16 %v470_v4  ;;  %v304_v8 = vunpack.c.h.bf16 %v470_v4  ;;  %v235_v9 = vunpack.c.l.bf16 %v468_v5  ;;  %v258_v10 = vunpack.c.h.bf16 %v468_v5  ;;  %v316_v11 = vld [vmem:[%s762_s3] sm:$0x1]  ;;  %p174_p10 = scmp.lt.s32.totalorder %s465_s18, 3  ;;  %s464_s29 = sshll.u32 %s170_s28, 3 }
  0x18   : > { %v193_v12 = vand.u32 127, %v192_v3  ;;  %vm319_vm0 = vcmp.lt.s32.totalorder %v192_v3, 32  ;;  %v190_v13 = vunpack.c.l.bf16 %v189_v6  ;;  %v212_v14 = vunpack.c.h.bf16 %v189_v6  ;;  %s498_s8 = sshll.u32 %s671_s2, 3  ;;  %s172_s12 = scalar_lea.vmem [#allocation12], %s464_s29 }
  0x19   : > { %v320_v15 = vsel %vm319_vm0, %v316_v11, %v15_v1  ;;  %s772_s18 = smov (!%p174_p10, %s465_s18), 3  ;;  %s394_s11 = scalar_lea.hbm %s764_s5, %s498_s8 }
  0x1a   : > { %vm195_vm1 = vcmp.lt.s32.totalorder %v193_v12, 32  ;;  %323 = vst [vmem:[#allocation15] sm:$0x1] %v320_v15  ;;  %s466_s19 = sshll.u32 %s772_s18, 2  ;;  %s729_s13 = sshll.u32 %s172_s12, 4  ;;  %s396_s13 = int_to_ptr.vmem [resolvable:$true] %s729_s13 }
  0x1b   : > { %v287_v16 = vsel %vm195_vm1, %v281_v7, %v648_v2  ;;  %v310_v17 = vsel %vm195_vm1, %v304_v8, %v648_v2  ;;  %v241_v18 = vsel %vm195_vm1, %v235_v9, %v648_v2  ;;  %v264_v19 = vsel %vm195_vm1, %v258_v10, %v648_v2  ;;  %s177_s26 = scalar_lea.vmem %s759_s0, %s466_s19  ;;  %s397_s14 = sshll.u32 %s394_s11, 4  ;;  %s398_s14 = int_to_ptr.hbm [resolvable:$true] %s397_s14 }
  0x1c   : > { %v289_v20 = vpack.c.bf16 0.0, %v287_v16  ;;  %v312_v21 = vpack.c.bf16 0.0, %v310_v17  ;;  %v243_v22 = vpack.c.bf16 0.0, %v241_v18  ;;  %v266_v23 = vpack.c.bf16 0.0, %v264_v19  ;;  %v494_v31 = vld [vmem:[%s177_s26] sm:$0xff]  ;;  %s383_s15 = scalar_lea.sflag [#allocation13], %s170_s28 }
  0x1d   : > { %v196_v24 = vsel %vm195_vm1, %v190_v13, %v648_v2  ;;  %v218_v25 = vsel %vm195_vm1, %v212_v14, %v648_v2  ;;  %s560_s2 = sshra.s32 %s398_s14, 4  ;;  %s566_s19 = scalar_lea.hbm %s764_s5, 16  ;;  %s561_s2 = int_to_ptr.hbm [resolvable:$true] %s560_s2 }
  0x1e   : > { %292 = vst [vmem:[#allocation14 + $0x10] sm:$0xf] %v289_v20  ;;  %v197_v26 = vpack.c.bf16 0.0, %v196_v24  ;;  %v220_v27 = vpack.c.bf16 0.0, %v218_v25  ;;  %s562_s16 = scalar_lea.hbm %s561_s2, 8  ;;  %p567_p0 = scmp.lt.s32.totalorder %s561_s2, %s764_s5 }
  0x1f   : > { %315 = vst [vmem:[#allocation14 + $0x14] sm:$0xf] %v312_v21  ;;  %p563_p11 = scmp.ne.s32.totalorder %s561_s2, %s562_s16  ;;  %p568_p1 = scmp.lt.s32.totalorder %s566_s19, %s562_s16 }
  0x20   : > { %246 = vst [vmem:[#allocation14 + $0x8] sm:$0xf] %v243_v22 }
  0x21   : > { %269 = vst [vmem:[#allocation14 + $0xc] sm:$0xf] %v266_v23  ;;  %v545_v33 = vld [vmem:[#allocation15] ss:$0 sm:$0xff]  ;;  %p564_p12 = pnand %p563_p11, %p688_p5  ;;  %p569_p2 = por %p568_p1, %p567_p0 }
  0x22   : > { %200 = vst [vmem:[#allocation14] sm:$0xf] %v197_v26 }
  0x23   : > { %223 = vst [vmem:[#allocation14 + $0x4] sm:$0xf] %v220_v27  ;;  %p565_p13 = pneg %p564_p12 }
  0x25   : > { %p570_p3 = pnand %p569_p2, %p565_p13 }
  0x26   : > { %v497_v28 = vld [vmem:[#allocation14 + $0x10] sm:$0xff] }
  0x27   : > { %369 = vmatpush.bf16.msra.mxu0 %v497_v28 }
  0x28   : > { %v496_v29 = vld [vmem:[#allocation14 + $0x8] sm:$0xff] }
  0x2a   : > { %v495_v30 = vld [vmem:[#allocation14] sm:$0xff] }
  0x2b   : > { %370 = vmatpush.bf16.msra.mxu0 %v496_v29 }
  0x2f   : > { %371 = vmatpush.bf16.msra.mxu0 %v495_v30 }
  0x32   : > { %488 = vmatmul.msk.bf16.vlgmr.msra.gmra.mxu0 %vm360_vm2, %v494_v31 }
  0xaf   : > { %v373_v32 = vpop.f32.mrf.mxu0 }
  0xb0   : > { %v374_v35 = vadd.f32 %v545_v33, %v373_v32 }
  0xb7   : > { %v375_v34 = vpop.f32.mrf.mxu0 }
  0xb8   : > { %v376_v36 = vadd.f32 %v545_v33, %v375_v34 }
  0xba   : > { %v502_v37 = vpack.c.bf16 %v376_v36, %v374_v35 }
  0xbc   : > { %503 = vst [vmem:[%s172_s12] sm:$0xff] %v502_v37  }
  0xbd   : > { %573 = shalt.err (!%p570_p3)
}
  0xbe   : > { %s610_s26 = smov 64   ;;  %s611_s28 = smov 4  }
  0xbf   : > { %504 = dma.vmem_to_hbm [thread:$0]  (%p688_p5), %s396_s13, 128, %s398_s14, %s383_s15, %s610_s26, %s610_s26, %s611_s28  }
  0xc0 PF: > { %p510_p4 = scmp.ge.s32.totalorder %s608_s25, 2  ;;  %s412_s29 = sand.u32 1, %s596_s22  }
  0xc1   : > { %s413_s8 = scalar_lea.sflag [#allocation13], %s412_s29 }
  0xc2   : > { %p507_p7 = pnand %p510_p4, %p692_p6 }
  0xc4   : > { %p508_p8 = pneg %p507_p7 }
  0xc6   : > { %591 = dma.done.wait (%p508_p8), %s413_s8, 128  }
  0xc7   : > { %593 = vsyncadd (%p508_p8), %s413_s8, 4294967168  ;;  %p21_p9 = scmp.ge.s32.totalorder %s675_s27, 4   ;;  %s767_s22 = smov %s600_s23 }
  0xc8   : > { %s768_s23 = smov %s604_s24  ;;  %s769_s24 = smov %s686_s30 }
  0xc9   : > { %s770_s25 = smov %s675_s27  ;;  %23 = sbr.rel (!%p21_p9) target bundleno = 6 (0x6), region = 77 }
  0xce   :  { %419 = vsyncpa [#allocation13], 1 }
  0xcf   :  { %421 = vsyncpa [#allocation13 + $0x1], 1 }

</bundles_post_ra>
